<compile_context>
chip_gen: v6e
topology: v6e:2x2x1
jax: 0.10.0
libtpu: 0.0.40
codegen_flags: <defaults>
</compile_context>

<pallas_src>
import functools

import jax
import jax.numpy as jnp
from jax.experimental import pallas as pl
from jax.experimental.pallas import tpu as pltpu


def _pool2x2_kernel(sel_ref, xr_ref, xi_ref, or_ref, oi_ref, *, W):
    """2x2/stride-2 max pool on super rows of shape (rblk, g*2*W) -> (rblk, g*Wo)."""
    L = xr_ref.shape[1]              # L = g * 2 * W
    sel = sel_ref[...]               # (L - W - 1, g*Wo) exact 0/1 one-hot matrix

    def pool(x):
        # H-pool: max(x[k], x[k+W]) is the vertical max for lane k of each
        # pooling-row segment (lanes >= W inside a segment are don't-care and
        # are never selected below).  Pure VPU, unit-stride slices only.
        h = jnp.maximum(x[:, : L - W], x[:, W:])
        # Horizontal neighbour max: the 2x2-window maxima live at lanes
        # k = j*2*W + 2*wo of m.
        m = jnp.maximum(h[:, : L - W - 1], h[:, 1:])
        # Exact one-hot selection matmul on the (otherwise idle) MXU extracts
        # those lanes without lane-strided slicing or minor-dim reshapes.
        # HIGHEST precision keeps the pick bit-exact for finite values.
        # TODO(synk): 0 * (+/-inf or NaN) in the selection matmul can poison a
        # row; finite activations are assumed (true for conv feature maps).
        return jnp.dot(
            m, sel,
            precision=jax.lax.Precision.HIGHEST,
            preferred_element_type=jnp.float32,
        )

    or_ref[...] = pool(xr_ref[...]).astype(or_ref.dtype)
    oi_ref[...] = pool(xi_ref[...]).astype(oi_ref.dtype)


def _pick_group(rows, W):
    """Largest divisor g of `rows` with g*2*W ~<= 128 lanes.

    Targets a full vreg lane width for the input block (dense VPU/VMEM) while
    bounding the selection-matmul contraction (~g*2*W) so the kernel stays
    mem-bound on all of v5e/v6e/v7x.
    """
    cap = min(max(1, 64 // W), rows)
    for g in range(cap, 0, -1):
        if rows % g == 0:
            return g
    return 1


def complex_maxpool2d(input_r, input_i, *, vmem_budget_bytes=12 << 20):
    """Pallas equivalent of complex_MaxPool2d.forward (NCHW in, NCHW out)."""
    assert input_r.shape == input_i.shape and input_r.dtype == input_i.dtype
    N, C, H, W = input_r.shape
    if (H % 2) or (W % 2):
        # nn.MaxPool2d(2) floors: drop the trailing odd row / column
        # (one extra HBM copy, only on this rare fallback path).
        input_r = input_r[:, :, : H - H % 2, : W - W % 2]
        input_i = input_i[:, :, : H - H % 2, : W - W % 2]
        N, C, H, W = input_r.shape
    Ho, Wo = H // 2, W // 2
    R = N * C * Ho                      # total number of pooling rows
    dtype = input_r.dtype
    itemsize = jnp.dtype(dtype).itemsize

    g = _pick_group(R, W)
    Rg = R // g                         # super rows
    L = g * 2 * W                       # input lanes per super row
    Lo = g * Wo                         # output lanes per super row
    Ls = L - W - 1                      # selection contraction length

    # Free (no-copy) row-major views: g consecutive pooling rows per super row.
    xr = input_r.reshape(Rg, L)
    xi = input_i.reshape(Rg, L)

    # Exact 0/1 selection matrix: column j*Wo + wo picks lane j*2*W + 2*wo.
    k_idx = jnp.arange(Ls, dtype=jnp.int32)[:, None]
    targets = (
        2 * W * jnp.arange(g, dtype=jnp.int32)[:, None]
        + 2 * jnp.arange(Wo, dtype=jnp.int32)[None, :]
    ).reshape(1, Lo)
    sel = (k_idx == targets).astype(jnp.float32)

    # Row-block size from a VMEM budget that fits v5e/v6e/v7x scoped VMEM:
    # 2 tensors x 2 pipeline buffers x (input row + output row), lanes padded
    # to 128 as they will be in VMEM.
    pad128 = lambda n: -(-n // 128) * 128
    bytes_per_row = 2 * 2 * (pad128(L) + pad128(Lo)) * itemsize
    rblk = max(8, (vmem_budget_bytes // bytes_per_row) // 8 * 8)
    if Rg > 8:
        # Keep at least 2 grid steps so both v7x TensorCores get work.
        rblk = min(rblk, -(-pl.cdiv(Rg, 2) // 8) * 8)
    rblk = min(rblk, Rg)
    grid = (pl.cdiv(Rg, rblk),)

    in_spec = pl.BlockSpec((rblk, L), lambda i: (i, 0))
    out_spec = pl.BlockSpec((rblk, Lo), lambda i: (i, 0))
    sel_spec = pl.BlockSpec((Ls, Lo), lambda i: (0, 0))
    out_sds = jax.ShapeDtypeStruct((Rg, Lo), dtype)

    pooled_r, pooled_i = pl.pallas_call(
        functools.partial(_pool2x2_kernel, W=W),
        grid=grid,
        in_specs=[sel_spec, in_spec, in_spec],
        out_specs=(out_spec, out_spec),
        out_shape=(out_sds, out_sds),
        compiler_params=pltpu.CompilerParams(
            dimension_semantics=("parallel",),
            vmem_limit_bytes=32 * 1024 * 1024,
        ),
    )(sel, xr, xi)

    # Free reshapes back to NCHW output layout.
    return (
        pooled_r.reshape(N, C, Ho, Wo),
        pooled_i.reshape(N, C, Ho, Wo),
    )


def _maxpool2x2_ref(x):
    """Pure-JAX reference for nn.MaxPool2d(2) on NCHW."""
    N, C, H, W = x.shape
    return x.reshape(N, C, H // 2, 2, W // 2, 2).max(axis=(3, 5))


if __name__ == "__main__":
    key = jax.random.PRNGKey(0)
    kr, ki = jax.random.split(key)
    # batch=2, channels=4, spatial=16x16 (NCHW, float32 — PyTorch default)
    x_r = jax.random.normal(kr, (2, 4, 16, 16), dtype=jnp.float32)
    x_i = jax.random.normal(ki, (2, 4, 16, 16), dtype=jnp.float32)

    out_r, out_i = jax.block_until_ready(complex_maxpool2d(x_r, x_i))

    ref_r = _maxpool2x2_ref(x_r)
    ref_i = _maxpool2x2_ref(x_i)
    assert out_r.shape == ref_r.shape == (2, 4, 8, 8)
    assert out_i.shape == ref_i.shape == (2, 4, 8, 8)
    assert jnp.allclose(out_r, ref_r, rtol=0.0, atol=1e-5), "real-part mismatch"
    assert jnp.allclose(out_i, ref_i, rtol=0.0, atol=1e-5), "imag-part mismatch"

    print("KERNEL_OK")
</pallas_src>

<mosaic_0001>
module attributes {stable_mosaic.version = 11 : i64} {
  func.func @_pool2x2_kernel(%arg0: i32, %arg1: memref<111x32xf32, #tpu.memory_space<vmem>>, %arg2: memref<8x128xf32, #tpu.memory_space<vmem>>, %arg3: memref<8x128xf32, #tpu.memory_space<vmem>>, %arg4: memref<8x32xf32, #tpu.memory_space<vmem>>, %arg5: memref<8x32xf32, #tpu.memory_space<vmem>>) attributes {dimension_semantics = [#tpu.dimension_semantics<parallel>], iteration_bounds = array<i64: 2>, scalar_prefetch = 0 : i64, scratch_operands = 0 : i64, tpu.core_type = #tpu.core_type<tc>, window_params = [{pipeline_mode = #tpu.pipeline_mode<synchronous>, transform_indices = @transform_0, window_bounds = array<i64: 111, 32>}, {transform_indices = @transform_1, window_bounds = array<i64: 8, 128>}, {transform_indices = @transform_2, window_bounds = array<i64: 8, 128>}, {transform_indices = @transform_3, window_bounds = array<i64: 8, 32>}, {transform_indices = @transform_4, window_bounds = array<i64: 8, 32>}]} {
    %c0 = arith.constant 0 : index
    %c0_0 = arith.constant 0 : index
    %0 = vector.load %arg1[%c0, %c0_0] : memref<111x32xf32, #tpu.memory_space<vmem>>, vector<111x32xf32>
    %c0_1 = arith.constant 0 : index
    %c0_2 = arith.constant 0 : index
    %1 = vector.load %arg2[%c0_1, %c0_2] : memref<8x128xf32, #tpu.memory_space<vmem>>, vector<8x128xf32>
    %2 = vector.extract_strided_slice %1 {offsets = [0, 0], sizes = [8, 112], strides = [1, 1]} : vector<8x128xf32> to vector<8x112xf32>
    %3 = vector.extract_strided_slice %1 {offsets = [0, 16], sizes = [8, 112], strides = [1, 1]} : vector<8x128xf32> to vector<8x112xf32>
    %4 = arith.maximumf %2, %3 : vector<8x112xf32>
    %5 = vector.extract_strided_slice %4 {offsets = [0, 0], sizes = [8, 111], strides = [1, 1]} : vector<8x112xf32> to vector<8x111xf32>
    %6 = vector.extract_strided_slice %4 {offsets = [0, 1], sizes = [8, 111], strides = [1, 1]} : vector<8x112xf32> to vector<8x111xf32>
    %7 = arith.maximumf %5, %6 : vector<8x111xf32>
    %cst = arith.constant dense<0.000000e+00> : vector<8x32xf32>
    %8 = tpu.matmul %7, %0, %cst {dimension_numbers = #tpu.dot_dimension_numbers<[1], [0], [0], [1], [0, 0, 1, 1], [], []>, precision = #tpu.contract_precision<fp32>} : vector<8x111xf32>, vector<111x32xf32>, vector<8x32xf32> -> vector<8x32xf32>
    %c0_3 = arith.constant 0 : index
    %c0_4 = arith.constant 0 : index
    %9 = vector.load %arg4[%c0_3, %c0_4] : memref<8x32xf32, #tpu.memory_space<vmem>>, vector<8x32xf32>
    tpu.vector_store %arg4[%c0_3, %c0_4], %8 {strides = array<i32>} : memref<8x32xf32, #tpu.memory_space<vmem>>, vector<8x32xf32>,
    %c0_5 = arith.constant 0 : index
    %c0_6 = arith.constant 0 : index
    %10 = vector.load %arg3[%c0_5, %c0_6] : memref<8x128xf32, #tpu.memory_space<vmem>>, vector<8x128xf32>
    %11 = vector.extract_strided_slice %10 {offsets = [0, 0], sizes = [8, 112], strides = [1, 1]} : vector<8x128xf32> to vector<8x112xf32>
    %12 = vector.extract_strided_slice %10 {offsets = [0, 16], sizes = [8, 112], strides = [1, 1]} : vector<8x128xf32> to vector<8x112xf32>
    %13 = arith.maximumf %11, %12 : vector<8x112xf32>
    %14 = vector.extract_strided_slice %13 {offsets = [0, 0], sizes = [8, 111], strides = [1, 1]} : vector<8x112xf32> to vector<8x111xf32>
    %15 = vector.extract_strided_slice %13 {offsets = [0, 1], sizes = [8, 111], strides = [1, 1]} : vector<8x112xf32> to vector<8x111xf32>
    %16 = arith.maximumf %14, %15 : vector<8x111xf32>
    %cst_7 = arith.constant dense<0.000000e+00> : vector<8x32xf32>
    %17 = tpu.matmul %16, %0, %cst_7 {dimension_numbers = #tpu.dot_dimension_numbers<[1], [0], [0], [1], [0, 0, 1, 1], [], []>, precision = #tpu.contract_precision<fp32>} : vector<8x111xf32>, vector<111x32xf32>, vector<8x32xf32> -> vector<8x32xf32>
    %c0_8 = arith.constant 0 : index
    %c0_9 = arith.constant 0 : index
    %18 = vector.load %arg5[%c0_8, %c0_9] : memref<8x32xf32, #tpu.memory_space<vmem>>, vector<8x32xf32>
    tpu.vector_store %arg5[%c0_8, %c0_9], %17 {strides = array<i32>} : memref<8x32xf32, #tpu.memory_space<vmem>>, vector<8x32xf32>,
    return
  }
  func.func @transform_0(%arg0: i32) -> (i32, i32) {
    %c0_i32 = arith.constant 0 : i32
    %c0_i32_0 = arith.constant 0 : i32
    %c0_i32_1 = arith.constant 0 : i32
    return %c0_i32, %c0_i32_0 : i32, i32
  }
  func.func @transform_1(%arg0: i32) -> (i32, i32) {
    %c0_i32 = arith.constant 0 : i32
    %c0_i32_0 = arith.constant 0 : i32
    return %arg0, %c0_i32 : i32, i32
  }
  func.func @transform_2(%arg0: i32) -> (i32, i32) {
    %c0_i32 = arith.constant 0 : i32
    %c0_i32_0 = arith.constant 0 : i32
    return %arg0, %c0_i32 : i32, i32
  }
  func.func @transform_3(%arg0: i32) -> (i32, i32) {
    %c0_i32 = arith.constant 0 : i32
    %c0_i32_0 = arith.constant 0 : i32
    return %arg0, %c0_i32 : i32, i32
  }
  func.func @transform_4(%arg0: i32) -> (i32, i32) {
    %c0_i32 = arith.constant 0 : i32
    %c0_i32_0 = arith.constant 0 : i32
    return %arg0, %c0_i32 : i32, i32
  }
}

</mosaic_0001>

<bundles_post_ra>
// kernel: tpu_custom_call.1
= control target key start
LH: loop header
LB: loop body
LE: loop exit
PB: predicated region body
PF: predicated region fallthrough
CT: control target
= control target key end

     0   :  { %10 = vsyncpa [#allocation3], 0  ;;  %s3103_s0 = inlined_call_operand.vmem [shape: f32[111,32], index: 0, kind: input, shape index: {}]   ;;  %s3104_s1 = inlined_call_operand.vmem [shape: f32[16,128], index: 1, kind: input, shape index: {}]   ;;  %s3105_s2 = inlined_call_operand.vmem [shape: f32[16,128], index: 2, kind: input, shape index: {}]   ;;  %s3106_s3 = inlined_call_operand.hbm [shape: f32[16,32], index: 3, kind: output, shape index: {0}]   ;;  %s3107_s4 = inlined_call_operand.hbm [shape: f32[16,32], index: 4, kind: output, shape index: {1}]  }
   0x1   :  { %12 = vsyncpa [#allocation3 + $0x1], 0 }
   0x2   :  { %13 = vsyncpa [#allocation5], 0 }
   0x3   :  { %15 = vsyncpa [#allocation5 + $0x1], 0  ;;  %s2373_s15 = smov 0   ;;  %s2375_s16 = smov 0  }
   0x4   :  { %s2377_s17 = smov 0   ;;  %s2379_s18 = smov 0  }
   0x5 LB: > { %s2394_s19 = sadd.s32 4294967295, %s2340_s18   ;;  %s1636_s20 = sadd.s32 4294967294, %s2340_s18   ;;  %s2340_s18 = sphi %s2379_s18, %s3125_s18   ;;  %s2336_s17 = sphi %s2377_s17, %s3124_s17   ;;  %s2332_s16 = sphi %s2375_s16, %s3123_s16   ;;  %s2328_s15 = sphi %s2373_s15, %s3122_s15  }
   0x6   : > { %s2398_s21 = sadd.s32 1, %s2340_s18   ;;  %s101_s22 = sadd.s32 1, %s2336_s17 }
   0x7   : > { %s98_s23 = ssub.s32 %s2340_s18, %s2398_s21  ;;  %p111_p0 = scmp.ne.s32.totalorder %s2336_s17, %s2332_s16 }
   0x8   : > { %p99_p1 = scmp.eq.s32.totalorder %s98_s23, 0  ;;  %p112_p2 = scmp.eq.s32.totalorder %s2394_s19, 1 }
   0x9   : > { %p117_p3 = scmp.ne.s32.totalorder %s2332_s16, %s2328_s15  ;;  %p118_p4 = scmp.eq.s32.totalorder %s1636_s20, 1 }
   0xa   : > { %s2409_s24 = scalar_select %p99_p1, %s2336_s17, %s101_s22  }
   0xb   : > { %p2411_p5 = por %p112_p2, %p111_p0  ;;  %p2415_p6 = por %p118_p4, %p117_p3 }
   0xc   : > { %p1639_p7 = scmp.ge.s32.totalorder %s2340_s18, 1  ;;  %p179_p8 = scmp.lt.s32.totalorder %s2340_s18, 3 }
   0xe   : > { %p180_p9 = pnand %p1639_p7, %p179_p8 }
  0x10   : > { %183 = sbr.rel (%p180_p9) target bundleno = 632 (0x278), region = 32 }
  0x15   : > { %p213_p10 = scmp.lt.s32.totalorder %s2394_s19, 1  ;;  %v234_v0 = vld [vmem:[%s3103_s0 + $0x68] sm:$0x7f]  ;;  %vm250_vm0 = vcmask 1046528   ;;  %v3111_v1 = vmov 0.0   ;;  %v233_v3 = vld [vmem:[%s3103_s0 + $0x60] sm:$0xff] }
  0x16   : > { %1861 = vmatprep.subr.mxu1 %v3111_v1  ;;  %v252_v2 = vsel %vm250_vm0, %v234_v0, 0  ;;  %v232_v4 = vld [vmem:[%s3103_s0 + $0x58] sm:$0xff]  ;;  %v231_v5 = vld [vmem:[%s3103_s0 + $0x50] sm:$0xff]  ;;  %1830 = vmatprep.subr.mxu0 %v3111_v1  ;;  %v2439_v7 = vand.u32 4294901760, %v233_v3  ;;  %v230_v10 = vld [vmem:[%s3103_s0 + $0x48] sm:$0xff]  ;;  %s2343_s8 = smov 112  }
  0x17   : > { %s214_s9 = scalar_select %p213_p10, %s2394_s19, 1  ;;  %v2437_v6 = vand.u32 4294901760, %v252_v2  ;;  %v2441_v8 = vand.u32 4294901760, %v232_v4  ;;  %v2443_v9 = vand.u32 4294901760, %v231_v5  ;;  %v2448_v11 = vand.u32 4294901760, %v230_v10  ;;  %v229_v12 = vld [vmem:[%s3103_s0 + $0x40] sm:$0xff] }
  0x18   : > { %v228_v13 = vld [vmem:[%s3103_s0 + $0x38] sm:$0xff]  ;;  %v227_v14 = vld [vmem:[%s3103_s0 + $0x30] sm:$0xff]  ;;  %v2463_v16 = vsub.f32 %v233_v3, %v2439_v7  ;;  %v2482_v20 = vand.u32 4294901760, %v229_v12  ;;  %v226_v37 = vld [vmem:[%s3103_s0 + $0x28] sm:$0xff]  ;;  %vm2344_vm1 = vmmov 0   ;;  %vm246_vm2 = vcmask 908288  }
  0x19   : > { %s1642_s27 = sshll.u32 %s214_s9, 3  ;;  %v2460_v15 = vsub.f32 %v252_v2, %v2437_v6  ;;  %v2466_v17 = vsub.f32 %v232_v4, %v2441_v8  ;;  %v2469_v18 = vsub.f32 %v231_v5, %v2443_v9  ;;  %1831 = vmatpush3.msra.mxu0 %v2437_v6  ;;  %v2479_v19 = vsub.f32 %v230_v10, %v2448_v11  ;;  %v225_v38 = vld [vmem:[%s3103_s0 + $0x20] sm:$0xff]  ;;  %v224_v39 = vld [vmem:[%s3103_s0 + $0x18] sm:$0xff]  ;;  %v223_v45 = vld [vmem:[%s3103_s0 + $0x10] sm:$0xff]  ;;  %s3040_s5 = sand.u32 1, %s2332_s16  }
  0x1a   : > { %s220_s30 = scalar_lea.vmem %s3105_s2, %s1642_s27  ;;  %s216_s7 = scalar_lea.vmem %s3104_s1, %s1642_s27  ;;  %1832 = vmatprep.subr.mxu0 %v3111_v1  ;;  %v2484_v21 = vand.u32 4294901760, %v228_v13  ;;  %v2486_v22 = vand.u32 4294901760, %v227_v14  ;;  %v2496_v26 = vand.u32 4294901760, %v2463_v16  ;;  %v2511_v30 = vsub.f32 %v229_v12, %v2482_v20  ;;  %1889 = vmatprep.mubr.msk.f32.mxu1 %vm2344_vm1, %v3111_v1 }
  0x1b   : > { %v2488_v23 = vld [vmem:[%s220_s30] sm:$0xff]  ;;  %v2493_v25 = vand.u32 4294901760, %v2460_v15  ;;  %v2499_v27 = vand.u32 4294901760, %v2466_v17  ;;  %v2502_v28 = vand.u32 4294901760, %v2469_v18  ;;  %1833 = vmatpush3.msra.mxu0 %v2439_v7  ;;  %v2508_v29 = vand.u32 4294901760, %v2479_v19  ;;  %1858 = vmatprep.mubr.msk.f32.mxu0 %vm2344_vm1, %v3111_v1  ;;  %s2345_s30 = smov 127  }
  0x1c   : > { %v2490_v24 = vld [vmem:[%s216_s7] sm:$0xff]  ;;  %873 = vrot.lane.b32.xlu1 %v2488_v23, %s2343_s8  ;;  %v2514_v31 = vsub.f32 %v228_v13, %v2484_v21  ;;  %v358_v33 = vsub.f32 %v2463_v16, %v2496_v26  ;;  %1834 = vmatprep.subr.mxu0 %v3111_v1  ;;  %v2527_v36 = vsub.f32 %v227_v14, %v2486_v22  ;;  %v2543_v42 = vand.u32 4294901760, %v2511_v30  ;;  %s1640_s6 = sshll.u32 %s3040_s5, 3  ;;  %s1646_s7 = sshll.u32 %s2394_s19, 7 }
  0x1d   : > { %237 = vrot.lane.b32.xlu0 %v2490_v24, %s2343_s8  ;;  %v351_v32 = vsub.f32 %v2460_v15, %v2493_v25  ;;  %v365_v34 = vsub.f32 %v2466_v17, %v2499_v27  ;;  %v372_v35 = vsub.f32 %v2469_v18, %v2502_v28  ;;  %1835 = vmatpush3.msra.mxu0 %v2441_v8  ;;  %v2559_v47 = vand.u32 4294901760, %v226_v37  ;;  %s205_s8 = scalar_lea.vmem [#allocation2], %s1640_s6  ;;  %s1518_s12 = scalar_lea.hbm %s3106_s3, %s1646_s7 }
  0x1e   : > { %v2540_v41 = vand.u32 4294901760, %v358_v33  ;;  %1836 = vmatprep.subr.mxu0 %v3111_v1  ;;  %v379_v43 = vsub.f32 %v2479_v19, %v2508_v29  ;;  %v2549_v44 = vand.u32 4294901760, %v2514_v31  ;;  %v2561_v48 = vand.u32 4294901760, %v225_v38  ;;  %s1520_s9 = sshll.u32 %s205_s8, 4  ;;  %s1502_s13 = scalar_lea.sflag [#allocation3], %s3040_s5  ;;  %s1521_s9 = int_to_ptr.vmem [resolvable:$true] %s1520_s9 }
  0x1f   : > { %v2538_v40 = vand.u32 4294901760, %v351_v32  ;;  %1837 = vmatpush3.msra.mxu0 %v2443_v9  ;;  %v2556_v46 = vand.u32 4294901760, %v365_v34  ;;  %v2563_v49 = vand.u32 4294901760, %v224_v39  ;;  %v2566_v50 = vand.u32 4294901760, %v372_v35  ;;  %v222_v35 = vld [vmem:[%s3103_s0 + $0x8] sm:$0xff]  ;;  %s2250_s14 = scalar_lea.vmem %s1521_s9, 128 }
  0x20   : > { %1838 = vmatprep.subr.mxu0 %v3111_v1  ;;  %v2569_v51 = vand.u32 4294901760, %v2527_v36  ;;  %v386_v52 = vsub.f32 %v2511_v30, %v2543_v42  ;;  %v2576_v53 = vsub.f32 %v226_v37, %v2559_v47  ;;  %v2580_v54 = vsub.f32 %v225_v38, %v2561_v48  ;;  %v221_v38 = vld [vmem:[%s3103_s0] sm:$0xff]  ;;  %p2251_p11 = scmp.ne.s32.totalorder %s1521_s9, %s2250_s14  ;;  %s2346_s20 = smov [#allocation2]  }
  0x21   : > { %1862 = vmatpush3.msra.mxu1 %v2538_v40  ;;  %1839 = vmatpush3.msra.mxu0 %v2448_v11  ;;  %v2582_v55 = vand.u32 4294901760, %v223_v45  ;;  %v2587_v56 = vand.u32 4294901760, %v379_v43  ;;  %v393_v57 = vsub.f32 %v2514_v31, %v2549_v44  ;;  %v2596_v59 = vsub.f32 %v224_v39, %v2563_v49  ;;  %s2254_s22 = sshll.u32 %s2346_s20, 4  ;;  %s2255_s22 = int_to_ptr.vmem [resolvable:$false] %s2254_s22 }
  0x22   : > { %1863 = vmatprep.subr.mxu1 %v3111_v1  ;;  %1840 = vmatprep.subr.mxu0 %v3111_v1  ;;  %v2592_v58 = vand.u32 4294901760, %v2576_v53  ;;  %v2601_v60 = vand.u32 4294901760, %v386_v52  ;;  %v400_v61 = vsub.f32 %v2527_v36, %v2569_v51  ;;  %v2606_v62 = vand.u32 4294901760, %v2580_v54  ;;  %p2252_p12 = pnand %p2251_p11, %p2411_p5  ;;  %s2256_s23 = scalar_lea.vmem %s2255_s22, 256 }
  0x23   : > { %1864 = vmatpush3.msra.mxu1 %v2540_v41  ;;  %1841 = vmatpush3.msra.mxu0 %v2482_v20  ;;  %v2610_v63 = vsub.f32 %v223_v45, %v2582_v55  ;;  %v2615_v0 = vand.u32 4294901760, %v393_v57  ;;  %v2620_v3 = vand.u32 4294901760, %v2596_v59  ;;  %v2668_v37 = vand.u32 4294901760, %v222_v35  ;;  %p2257_p0 = scmp.lt.s32.totalorder %s1521_s9, %s2255_s22  ;;  %p2258_p1 = scmp.lt.s32.totalorder %s2256_s23, %s2250_s14 }
  0x24   : > { %1865 = vmatprep.subr.mxu1 %v3111_v1  ;;  %1842 = vmatprep.subr.mxu0 %v3111_v1  ;;  %v407_v2 = vsub.f32 %v2576_v53, %v2592_v58  ;;  %v2626_v4 = vand.u32 4294901760, %v400_v61  ;;  %v414_v5 = vsub.f32 %v2580_v54, %v2606_v62  ;;  %v2676_v43 = vand.u32 4294901760, %v221_v38  ;;  %p2253_p13 = pneg %p2252_p12 }
  0x25   : > { %1866 = vmatpush3.msra.mxu1 %v2556_v46  ;;  %1843 = vmatpush3.msra.mxu0 %v2484_v21  ;;  %v2631_v10 = vand.u32 4294901760, %v2610_v63  ;;  %v421_v13 = vsub.f32 %v2596_v59, %v2620_v3  ;;  %v2674_v39 = vsub.f32 %v222_v35, %v2668_v37  ;;  %vm869_vm3 = vcmask 261120   ;;  %p2259_p2 = por %p2258_p1, %p2257_p0 }
  0x26   : > { %1867 = vmatprep.subr.mxu1 %v3111_v1  ;;  %1844 = vmatprep.subr.mxu0 %v3111_v1  ;;  %v2637_v12 = vand.u32 4294901760, %v407_v2  ;;  %v2645_v14 = vand.u32 4294901760, %v414_v5  ;;  %v2684_v52 = vsub.f32 %v221_v38, %v2676_v43 }
  0x27   : > { %1868 = vmatpush3.msra.mxu1 %v2566_v50  ;;  %1845 = vmatpush3.msra.mxu0 %v2486_v22  ;;  %v428_v32 = vsub.f32 %v2610_v63, %v2631_v10  ;;  %v2653_v33 = vand.u32 4294901760, %v421_v13  ;;  %v2681_v45 = vand.u32 4294901760, %v2674_v39  ;;  %p2260_p3 = pnand %p2259_p2, %p2253_p13 }
  0x28   : > { %1869 = vmatprep.subr.mxu1 %v3111_v1  ;;  %1846 = vmatprep.subr.mxu0 %v3111_v1  ;;  %v2691_v61 = vand.u32 4294901760, %v2684_v52 }
  0x29   : > { %1870 = vmatpush3.msra.mxu1 %v2587_v56  ;;  %1847 = vmatpush3.msra.mxu0 %v2559_v47  ;;  %v2658_v34 = vand.u32 4294901760, %v428_v32  ;;  %v435_v57 = vsub.f32 %v2674_v39, %v2681_v45 }
  0x2a   : > { %1871 = vmatprep.subr.mxu1 %v3111_v1  ;;  %1848 = vmatprep.subr.mxu0 %v3111_v1  ;;  %v442_v5 = vsub.f32 %v2684_v52, %v2691_v61 }
  0x2b   : > { %1872 = vmatpush3.msra.mxu1 %v2601_v60  ;;  %1849 = vmatpush3.msra.mxu0 %v2561_v48  ;;  %3115 = vst [vmem:[#allocation8_spill] sm:$0xff] %v2658_v34  ;;  %v2693_v2 = vand.u32 4294901760, %v435_v57 }
  0x2c   : > { %1873 = vmatprep.subr.mxu1 %v3111_v1  ;;  %1850 = vmatprep.subr.mxu0 %v3111_v1  ;;  %v2698_v13 = vand.u32 4294901760, %v442_v5 }
  0x2d   : > { %1874 = vmatpush3.msra.mxu1 %v2615_v0  ;;  %1851 = vmatpush3.msra.mxu0 %v2563_v49  ;;  %3116 = vst [vmem:[#allocation9_spill] sm:$0xff] %v2693_v2 }
  0x2e   : > { %1875 = vmatprep.subr.mxu1 %v3111_v1  ;;  %1852 = vmatprep.subr.mxu0 %v3111_v1  ;;  %3117 = vst [vmem:[#allocation10_spill] sm:$0xff] %v2698_v13 }
  0x2f   : > { %1876 = vmatpush3.msra.mxu1 %v2626_v4  ;;  %1853 = vmatpush3.msra.mxu0 %v2582_v55 }
  0x30   : > { %1877 = vmatprep.subr.mxu1 %v3111_v1  ;;  %1854 = vmatprep.subr.mxu0 %v3111_v1 }
  0x31   : > { %1878 = vmatpush3.msra.mxu1 %v2637_v12  ;;  %1855 = vmatpush3.msra.mxu0 %v2668_v37 }
  0x32   : > { %1879 = vmatprep.subr.mxu1 %v3111_v1  ;;  %1856 = vmatprep.subr.mxu0 %v3111_v1 }
  0x33   : > { %1880 = vmatpush3.msra.mxu1 %v2645_v14  ;;  %1857 = vmatpush3.msra.mxu0 %v2676_v43 }
  0x34   : > { %1881 = vmatprep.subr.mxu1 %v3111_v1  ;;  %1892 = vmatprep.subr.mxu0 %v3111_v1 }
  0x35   : > { %1882 = vmatpush3.msra.mxu1 %v2653_v33 }
  0x36   : > { %1883 = vmatprep.subr.mxu1 %v3111_v1 }
  0x37   : > { %1884 = vmatpush3.msra.mxu1 %v2658_v34 }
  0x38   : > { %1885 = vmatprep.subr.mxu1 %v3111_v1 }
  0x39   : > { %1886 = vmatpush3.msra.mxu1 %v2693_v2 }
  0x3a   : > { %1887 = vmatprep.subr.mxu1 %v3111_v1 }
  0x3b   : > { %1888 = vmatpush3.msra.mxu1 %v2698_v13 }
  0x3c   : > { %1923 = vmatprep.subr.mxu1 %v3111_v1 }
  0x8e   : > { %v874_v32 = vpop.permute.xlu1 %873 }
  0x8f   : > { %v238_v35 = vpop.permute.xlu0 %237  ;;  %v2708_v38 = vmax.f32 %v2488_v23, %v874_v32  ;;  %v3118_v23 = vmov 0.0  }
  0x90   : > { %v240_v57 = vmax.f32 %v2490_v24, %v238_v35 }
  0x91   : > { %878 = vrot.lane.b32.xlu1 %v2708_v38, %s2345_s30 }
  0x92   : > { %242 = vrot.lane.b32.xlu0 %v240_v57, %s2345_s30 }
 0x104   : > { %v243_v5 = vpop.permute.xlu0 %242 }
 0x105   : > { %v245_v13 = vmax.f32 %v240_v57, %v243_v5 }
 0x107   : > { %v248_v2 = vsel %vm246_vm2, %v245_v13, 0 }
 0x108   : > { %v2713_v34 = vand.u32 4294901760, %v248_v2 }
 0x10a   : > { %v2716_v1 = vsub.f32 %v248_v2, %v2713_v34  ;;  %1890 = vmatmul.mubr.f32.vlgmr.msra.gmra.mxu1 %v2713_v34 }
 0x10b   : > { %1924 = vmatpush3.msra.mxu1 %v2437_v6  ;;  %1951 = vmatprep.mubr.msk.f32.mxu1 %vm2344_vm1, %v3118_v23 }
 0x10c   : > { %1925 = vmatprep.subr.mxu1 %v3118_v23  ;;  %v335_v24 = vand.u32 4294901760, %v2716_v1 }
 0x10d   : > { %1926 = vmatpush3.msra.mxu1 %v2439_v7 }
 0x10e   : > { %1927 = vmatprep.subr.mxu1 %v3118_v23  ;;  %v336_v13 = vsub.f32 %v2716_v1, %v335_v24 }
 0x10f   : > { %1928 = vmatpush3.msra.mxu1 %v2441_v8 }
 0x110   : > { %1929 = vmatprep.subr.mxu1 %v3118_v23  ;;  %v337_v2 = vand.u32 4294901760, %v336_v13 }
 0x111   : > { %1930 = vmatpush3.msra.mxu1 %v2443_v9 }
 0x112   : > { %1931 = vmatprep.subr.mxu1 %v3118_v23  ;;  %1859 = vmatmul.mubr.f32.vlgmr.msra.gmra.mxu0 %v337_v2 }
 0x113   : > { %1893 = vmatpush3.msra.mxu0 %v2460_v15  ;;  %1932 = vmatpush3.msra.mxu1 %v2448_v11 }
 0x114   : > { %1894 = vmatprep.subr.mxu0 %v3118_v23  ;;  %1933 = vmatprep.subr.mxu1 %v3118_v23 }
 0x115   : > { %1895 = vmatpush3.msra.mxu0 %v2463_v16  ;;  %1934 = vmatpush3.msra.mxu1 %v2482_v20 }
 0x116   : > { %1896 = vmatprep.subr.mxu0 %v3118_v23  ;;  %1935 = vmatprep.subr.mxu1 %v3118_v23 }
 0x117   : > { %1897 = vmatpush3.msra.mxu0 %v2466_v17  ;;  %1936 = vmatpush3.msra.mxu1 %v2484_v21 }
 0x118   : > { %1898 = vmatprep.subr.mxu0 %v3118_v23  ;;  %1937 = vmatprep.subr.mxu1 %v3118_v23 }
 0x119   : > { %1899 = vmatpush3.msra.mxu0 %v2469_v18  ;;  %1938 = vmatpush3.msra.mxu1 %v2486_v22 }
 0x11a   : > { %1900 = vmatprep.subr.mxu0 %v3118_v23  ;;  %1939 = vmatprep.subr.mxu1 %v3118_v23 }
 0x11b   : > { %1901 = vmatpush3.msra.mxu0 %v2479_v19  ;;  %1940 = vmatpush3.msra.mxu1 %v2559_v47 }
 0x11c   : > { %1902 = vmatprep.subr.mxu0 %v3118_v23  ;;  %1941 = vmatprep.subr.mxu1 %v3118_v23 }
 0x11d   : > { %1903 = vmatpush3.msra.mxu0 %v2511_v30  ;;  %1942 = vmatpush3.msra.mxu1 %v2561_v48 }
 0x11e   : > { %1904 = vmatprep.subr.mxu0 %v3118_v23  ;;  %1943 = vmatprep.subr.mxu1 %v3118_v23 }
 0x11f   : > { %1905 = vmatpush3.msra.mxu0 %v2514_v31  ;;  %1944 = vmatpush3.msra.mxu1 %v2563_v49 }
 0x120   : > { %1906 = vmatprep.subr.mxu0 %v3118_v23  ;;  %1945 = vmatprep.subr.mxu1 %v3118_v23 }
 0x121   : > { %1907 = vmatpush3.msra.mxu0 %v2527_v36  ;;  %1946 = vmatpush3.msra.mxu1 %v2582_v55 }
 0x122   : > { %1908 = vmatprep.subr.mxu0 %v3118_v23  ;;  %1947 = vmatprep.subr.mxu1 %v3118_v23 }
 0x123   : > { %1909 = vmatpush3.msra.mxu0 %v2576_v53  ;;  %1948 = vmatpush3.msra.mxu1 %v2668_v37 }
 0x124   : > { %1910 = vmatprep.subr.mxu0 %v3118_v23  ;;  %1949 = vmatprep.subr.mxu1 %v3118_v23 }
 0x125   : > { %1911 = vmatpush3.msra.mxu0 %v2580_v54  ;;  %1950 = vmatpush3.msra.mxu1 %v2676_v43 }
 0x126   : > { %1912 = vmatprep.subr.mxu0 %v3118_v23  ;;  %1952 = vmatmul.mubr.f32.vlgmr.msra.gmra.mxu1 %v335_v24 }
 0x127   : > { %1985 = vmatprep.subr.mxu1 %v3118_v23  ;;  %1913 = vmatpush3.msra.mxu0 %v2596_v59 }
 0x128   : > { %1986 = vmatpush3.msra.mxu1 %v2437_v6  ;;  %1914 = vmatprep.subr.mxu0 %v3118_v23 }
 0x129   : > { %1987 = vmatprep.subr.mxu1 %v3118_v23  ;;  %1915 = vmatpush3.msra.mxu0 %v2610_v63 }
 0x12a   : > { %1988 = vmatpush3.msra.mxu1 %v2439_v7  ;;  %1916 = vmatprep.subr.mxu0 %v3118_v23 }
 0x12b   : > { %1989 = vmatprep.subr.mxu1 %v3118_v23  ;;  %1917 = vmatpush3.msra.mxu0 %v2674_v39 }
 0x12c   : > { %1990 = vmatpush3.msra.mxu1 %v2441_v8  ;;  %1918 = vmatprep.subr.mxu0 %v3118_v23 }
 0x12d   : > { %1991 = vmatprep.subr.mxu1 %v3118_v23  ;;  %1919 = vmatpush3.msra.mxu0 %v2684_v52 }
 0x12e   : > { %1920 = vmatprep.mubr.msk.f32.mxu0 %vm2344_vm1, %v3118_v23  ;;  %1992 = vmatpush3.msra.mxu1 %v2443_v9 }
 0x12f   : > { %1921 = vmatmul.mubr.f32.vlgmr.msra.gmra.mxu0 %v2716_v1  ;;  %1954 = vmatprep.subr.mxu0 %v3118_v23  ;;  %v879_v1 = vpop.permute.xlu1 %878 }
 0x130   : > { %1993 = vmatprep.subr.mxu1 %v3118_v23  ;;  %1955 = vmatpush3.msra.mxu0 %v2493_v25 }
 0x131   : > { %1994 = vmatpush3.msra.mxu1 %v2448_v11  ;;  %1956 = vmatprep.subr.mxu0 %v3118_v23 }
 0x132   : > { %1995 = vmatprep.subr.mxu1 %v3118_v23  ;;  %1957 = vmatpush3.msra.mxu0 %v2496_v26 }
 0x133   : > { %1996 = vmatpush3.msra.mxu1 %v2482_v20  ;;  %1958 = vmatprep.subr.mxu0 %v3118_v23 }
 0x134   : > { %1997 = vmatprep.subr.mxu1 %v3118_v23  ;;  %1959 = vmatpush3.msra.mxu0 %v2499_v27 }
 0x135   : > { %1998 = vmatpush3.msra.mxu1 %v2484_v21  ;;  %1960 = vmatprep.subr.mxu0 %v3118_v23 }
 0x136   : > { %1999 = vmatprep.subr.mxu1 %v3118_v23  ;;  %1961 = vmatpush3.msra.mxu0 %v2502_v28 }
 0x137   : > { %2000 = vmatpush3.msra.mxu1 %v2486_v22  ;;  %1962 = vmatprep.subr.mxu0 %v3118_v23 }
 0x138   : > { %2001 = vmatprep.subr.mxu1 %v3118_v23  ;;  %1963 = vmatpush3.msra.mxu0 %v2508_v29 }
 0x139   : > { %2002 = vmatpush3.msra.mxu1 %v2559_v47  ;;  %1964 = vmatprep.subr.mxu0 %v3118_v23 }
 0x13a   : > { %2003 = vmatprep.subr.mxu1 %v3118_v23  ;;  %1965 = vmatpush3.msra.mxu0 %v2543_v42 }
 0x13b   : > { %2004 = vmatpush3.msra.mxu1 %v2561_v48  ;;  %1966 = vmatprep.subr.mxu0 %v3118_v23 }
 0x13c   : > { %2005 = vmatprep.subr.mxu1 %v3118_v23  ;;  %1967 = vmatpush3.msra.mxu0 %v2549_v44 }
 0x13d   : > { %2006 = vmatpush3.msra.mxu1 %v2563_v49  ;;  %1968 = vmatprep.subr.mxu0 %v3118_v23 }
 0x13e   : > { %2007 = vmatprep.subr.mxu1 %v3118_v23  ;;  %1969 = vmatpush3.msra.mxu0 %v2569_v51 }
 0x13f   : > { %2008 = vmatpush3.msra.mxu1 %v2582_v55  ;;  %1970 = vmatprep.subr.mxu0 %v3118_v23 }
 0x140   : > { %2009 = vmatprep.subr.mxu1 %v3118_v23  ;;  %1971 = vmatpush3.msra.mxu0 %v2592_v58 }
 0x141   : > { %2010 = vmatpush3.msra.mxu1 %v2668_v37  ;;  %1972 = vmatprep.subr.mxu0 %v3118_v23 }
 0x142   : > { %2011 = vmatprep.subr.mxu1 %v3118_v23  ;;  %1973 = vmatpush3.msra.mxu0 %v2606_v62 }
 0x143   : > { %2012 = vmatpush3.msra.mxu1 %v2676_v43  ;;  %2013 = vmatprep.mubr.msk.f32.mxu1 %vm2344_vm1, %v3118_v23 }
 0x144   : > { %1974 = vmatprep.subr.mxu0 %v3118_v23  ;;  %2014 = vmatmul.mubr.f32.vlgmr.msra.gmra.mxu1 %v2713_v34 }
 0x145   : > { %2047 = vmatprep.subr.mxu1 %v3118_v23  ;;  %1975 = vmatpush3.msra.mxu0 %v2620_v3 }
 0x146   : > { %2048 = vmatpush3.msra.mxu1 %v2538_v40  ;;  %1976 = vmatprep.subr.mxu0 %v3118_v23  ;;  %v881_v40 = vmax.f32 %v2708_v38, %v879_v1 }
 0x147   : > { %2049 = vmatprep.subr.mxu1 %v3118_v23  ;;  %1977 = vmatpush3.msra.mxu0 %v2631_v10 }
 0x148   : > { %2050 = vmatpush3.msra.mxu1 %v2540_v41  ;;  %1978 = vmatprep.subr.mxu0 %v3118_v23  ;;  %v883_v41 = vsel %vm246_vm2, %v881_v40, 0 }
 0x149   : > { %2051 = vmatprep.subr.mxu1 %v3118_v23  ;;  %1979 = vmatpush3.msra.mxu0 %v2681_v45 }
 0x14a   : > { %2052 = vmatpush3.msra.mxu1 %v2556_v46  ;;  %1980 = vmatprep.subr.mxu0 %v3118_v23  ;;  %v2875_v46 = vand.u32 4294901760, %v883_v41 }
 0x14b   : > { %2053 = vmatprep.subr.mxu1 %v3118_v23  ;;  %1981 = vmatpush3.msra.mxu0 %v2691_v61 }
 0x14c   : > { %1982 = vmatprep.mubr.msk.f32.mxu0 %vm2344_vm1, %v3118_v23  ;;  %2054 = vmatpush3.msra.mxu1 %v2566_v50  ;;  %v2886_v50 = vsub.f32 %v883_v41, %v2875_v46 }
 0x14d   : > { %1983 = vmatmul.mubr.f32.vlgmr.msra.gmra.mxu0 %v2713_v34  ;;  %2016 = vmatprep.subr.mxu0 %v3118_v23 }
 0x14e   : > { %2055 = vmatprep.subr.mxu1 %v3118_v23  ;;  %2017 = vmatpush3.msra.mxu0 %v2437_v6 }
 0x14f   : > { %2056 = vmatpush3.msra.mxu1 %v2587_v56  ;;  %2018 = vmatprep.subr.mxu0 %v3118_v23  ;;  %v3119_v56 = vld [vmem:[#allocation8_spill] sm:$0xff] }
 0x150   : > { %2057 = vmatprep.subr.mxu1 %v3118_v23  ;;  %2019 = vmatpush3.msra.mxu0 %v2439_v7 }
 0x151   : > { %2058 = vmatpush3.msra.mxu1 %v2601_v60  ;;  %2020 = vmatprep.subr.mxu0 %v3118_v23  ;;  %v3120_v60 = vld [vmem:[#allocation9_spill] sm:$0xff] }
 0x152   : > { %2059 = vmatprep.subr.mxu1 %v3118_v23  ;;  %2021 = vmatpush3.msra.mxu0 %v2441_v8 }
 0x153   : > { %2060 = vmatpush3.msra.mxu1 %v2615_v0  ;;  %2022 = vmatprep.subr.mxu0 %v3118_v23  ;;  %v966_v0 = vand.u32 4294901760, %v2886_v50 }
 0x154   : > { %2061 = vmatprep.subr.mxu1 %v3118_v23  ;;  %2023 = vmatpush3.msra.mxu0 %v2443_v9 }
 0x155   : > { %2062 = vmatpush3.msra.mxu1 %v2626_v4  ;;  %2024 = vmatprep.subr.mxu0 %v3118_v23  ;;  %v3121_v4 = vld [vmem:[#allocation10_spill] sm:$0xff] }
 0x156   : > { %2063 = vmatprep.subr.mxu1 %v3118_v23  ;;  %2025 = vmatpush3.msra.mxu0 %v2448_v11 }
 0x157   : > { %2064 = vmatpush3.msra.mxu1 %v2637_v12  ;;  %2026 = vmatprep.subr.mxu0 %v3118_v23  ;;  %v967_v12 = vsub.f32 %v2886_v50, %v966_v0 }
 0x158   : > { %2065 = vmatprep.subr.mxu1 %v3118_v23  ;;  %2027 = vmatpush3.msra.mxu0 %v2482_v20 }
 0x159   : > { %2066 = vmatpush3.msra.mxu1 %v2645_v14  ;;  %2028 = vmatprep.subr.mxu0 %v3118_v23  ;;  %v968_v14 = vand.u32 4294901760, %v967_v12 }
 0x15a   : > { %2067 = vmatprep.subr.mxu1 %v3118_v23  ;;  %2029 = vmatpush3.msra.mxu0 %v2484_v21 }
 0x15b   : > { %2068 = vmatpush3.msra.mxu1 %v2653_v33  ;;  %2030 = vmatprep.subr.mxu0 %v3118_v23 }
 0x15c   : > { %2069 = vmatprep.subr.mxu1 %v3118_v23  ;;  %2031 = vmatpush3.msra.mxu0 %v2486_v22 }
 0x15d   : > { %2070 = vmatpush3.msra.mxu1 %v3119_v56  ;;  %2032 = vmatprep.subr.mxu0 %v3118_v23 }
 0x15e   : > { %2071 = vmatprep.subr.mxu1 %v3118_v23  ;;  %2033 = vmatpush3.msra.mxu0 %v2559_v47 }
 0x15f   : > { %2072 = vmatpush3.msra.mxu1 %v3120_v60  ;;  %2034 = vmatprep.subr.mxu0 %v3118_v23 }
 0x160   : > { %2073 = vmatprep.subr.mxu1 %v3118_v23  ;;  %2035 = vmatpush3.msra.mxu0 %v2561_v48 }
 0x161   : > { %2074 = vmatpush3.msra.mxu1 %v3121_v4  ;;  %2075 = vmatprep.mubr.msk.f32.mxu1 %vm2344_vm1, %v3118_v23 }
 0x162   : > { %2036 = vmatprep.subr.mxu0 %v3118_v23  ;;  %2076 = vmatmul.mubr.f32.vlgmr.msra.gmra.mxu1 %v2875_v46 }
 0x163   : > { %2109 = vmatprep.subr.mxu1 %v3118_v23  ;;  %2037 = vmatpush3.msra.mxu0 %v2563_v49 }
 0x164   : > { %2110 = vmatpush3.msra.mxu1 %v2437_v6  ;;  %2038 = vmatprep.subr.mxu0 %v3118_v23 }
 0x165   : > { %2111 = vmatprep.subr.mxu1 %v3118_v23  ;;  %2039 = vmatpush3.msra.mxu0 %v2582_v55 }
 0x166   : > { %2112 = vmatpush3.msra.mxu1 %v2439_v7  ;;  %2040 = vmatprep.subr.mxu0 %v3118_v23 }
 0x167   : > { %2113 = vmatprep.subr.mxu1 %v3118_v23  ;;  %2041 = vmatpush3.msra.mxu0 %v2668_v37 }
 0x168   : > { %2114 = vmatpush3.msra.mxu1 %v2441_v8  ;;  %2042 = vmatprep.subr.mxu0 %v3118_v23 }
 0x169   : > { %2115 = vmatprep.subr.mxu1 %v3118_v23  ;;  %2043 = vmatpush3.msra.mxu0 %v2676_v43 }
 0x16a   : > { %2044 = vmatprep.mubr.msk.f32.mxu0 %vm2344_vm1, %v3118_v23  ;;  %2116 = vmatpush3.msra.mxu1 %v2443_v9 }
 0x16b   : > { %2045 = vmatmul.mubr.f32.vlgmr.msra.gmra.mxu0 %v968_v14  ;;  %2078 = vmatprep.subr.mxu0 %v3118_v23 }
 0x16c   : > { %2117 = vmatprep.subr.mxu1 %v3118_v23  ;;  %2079 = vmatpush3.msra.mxu0 %v2460_v15 }
 0x16d   : > { %2118 = vmatpush3.msra.mxu1 %v2448_v11  ;;  %2080 = vmatprep.subr.mxu0 %v3118_v23 }
 0x16e   : > { %2119 = vmatprep.subr.mxu1 %v3118_v23  ;;  %2081 = vmatpush3.msra.mxu0 %v2463_v16 }
 0x16f   : > { %2120 = vmatpush3.msra.mxu1 %v2482_v20  ;;  %2082 = vmatprep.subr.mxu0 %v3118_v23 }
 0x170   : > { %2121 = vmatprep.subr.mxu1 %v3118_v23  ;;  %2083 = vmatpush3.msra.mxu0 %v2466_v17 }
 0x171   : > { %2122 = vmatpush3.msra.mxu1 %v2484_v21  ;;  %2084 = vmatprep.subr.mxu0 %v3118_v23 }
 0x172   : > { %2123 = vmatprep.subr.mxu1 %v3118_v23  ;;  %2085 = vmatpush3.msra.mxu0 %v2469_v18 }
 0x173   : > { %2124 = vmatpush3.msra.mxu1 %v2486_v22  ;;  %2086 = vmatprep.subr.mxu0 %v3118_v23 }
 0x174   : > { %2125 = vmatprep.subr.mxu1 %v3118_v23  ;;  %2087 = vmatpush3.msra.mxu0 %v2479_v19 }
 0x175   : > { %2126 = vmatpush3.msra.mxu1 %v2559_v47  ;;  %2088 = vmatprep.subr.mxu0 %v3118_v23 }
 0x176   : > { %2127 = vmatprep.subr.mxu1 %v3118_v23  ;;  %2089 = vmatpush3.msra.mxu0 %v2511_v30 }
 0x177   : > { %2128 = vmatpush3.msra.mxu1 %v2561_v48  ;;  %2090 = vmatprep.subr.mxu0 %v3118_v23 }
 0x178   : > { %2129 = vmatprep.subr.mxu1 %v3118_v23  ;;  %2091 = vmatpush3.msra.mxu0 %v2514_v31 }
 0x179   : > { %2130 = vmatpush3.msra.mxu1 %v2563_v49  ;;  %2092 = vmatprep.subr.mxu0 %v3118_v23 }
 0x17a   : > { %2131 = vmatprep.subr.mxu1 %v3118_v23  ;;  %2093 = vmatpush3.msra.mxu0 %v2527_v36 }
 0x17b   : > { %2132 = vmatpush3.msra.mxu1 %v2582_v55  ;;  %2094 = vmatprep.subr.mxu0 %v3118_v23 }
 0x17c   : > { %2133 = vmatprep.subr.mxu1 %v3118_v23  ;;  %2095 = vmatpush3.msra.mxu0 %v2576_v53 }
 0x17d   : > { %2134 = vmatpush3.msra.mxu1 %v2668_v37  ;;  %2096 = vmatprep.subr.mxu0 %v3118_v23 }
 0x17e   : > { %2135 = vmatprep.subr.mxu1 %v3118_v23  ;;  %2097 = vmatpush3.msra.mxu0 %v2580_v54 }
 0x17f   : > { %2136 = vmatpush3.msra.mxu1 %v2676_v43  ;;  %2137 = vmatprep.mubr.msk.f32.mxu1 %vm2344_vm1, %v3118_v23 }
 0x180   : > { %2098 = vmatprep.subr.mxu0 %v3118_v23  ;;  %2138 = vmatmul.mubr.f32.vlgmr.msra.gmra.mxu1 %v966_v0 }
 0x181   : > { %2171 = vmatprep.subr.mxu1 %v3118_v23  ;;  %2099 = vmatpush3.msra.mxu0 %v2596_v59 }
 0x182   : > { %2172 = vmatpush3.msra.mxu1 %v2437_v6  ;;  %2100 = vmatprep.subr.mxu0 %v3118_v23 }
 0x183   : > { %2173 = vmatprep.subr.mxu1 %v3118_v23  ;;  %2101 = vmatpush3.msra.mxu0 %v2610_v63 }
 0x184   : > { %2174 = vmatpush3.msra.mxu1 %v2439_v7  ;;  %2102 = vmatprep.subr.mxu0 %v3118_v23 }
 0x185   : > { %2175 = vmatprep.subr.mxu1 %v3118_v23  ;;  %2103 = vmatpush3.msra.mxu0 %v2674_v39 }
 0x186   : > { %2176 = vmatpush3.msra.mxu1 %v2441_v8  ;;  %2104 = vmatprep.subr.mxu0 %v3118_v23 }
 0x187   : > { %2177 = vmatprep.subr.mxu1 %v3118_v23  ;;  %2105 = vmatpush3.msra.mxu0 %v2684_v52 }
 0x188   : > { %2106 = vmatprep.mubr.msk.f32.mxu0 %vm2344_vm1, %v3118_v23  ;;  %2178 = vmatpush3.msra.mxu1 %v2443_v9 }
 0x189   : > { %2107 = vmatmul.mubr.f32.vlgmr.msra.gmra.mxu0 %v2886_v50  ;;  %2140 = vmatprep.subr.mxu0 %v3118_v23 }
 0x18a   : > { %2179 = vmatprep.subr.mxu1 %v3118_v23  ;;  %2141 = vmatpush3.msra.mxu0 %v2493_v25 }
 0x18b   : > { %2180 = vmatpush3.msra.mxu1 %v2448_v11  ;;  %2142 = vmatprep.subr.mxu0 %v3118_v23 }
 0x18c   : > { %2181 = vmatprep.subr.mxu1 %v3118_v23  ;;  %2143 = vmatpush3.msra.mxu0 %v2496_v26 }
 0x18d   : > { %2182 = vmatpush3.msra.mxu1 %v2482_v20  ;;  %2144 = vmatprep.subr.mxu0 %v3118_v23 }
 0x18e   : > { %2183 = vmatprep.subr.mxu1 %v3118_v23  ;;  %2145 = vmatpush3.msra.mxu0 %v2499_v27 }
 0x18f   : > { %2184 = vmatpush3.msra.mxu1 %v2484_v21  ;;  %2146 = vmatprep.subr.mxu0 %v3118_v23 }
 0x190   : > { %2185 = vmatprep.subr.mxu1 %v3118_v23  ;;  %2147 = vmatpush3.msra.mxu0 %v2502_v28 }
 0x191   : > { %2186 = vmatpush3.msra.mxu1 %v2486_v22  ;;  %2148 = vmatprep.subr.mxu0 %v3118_v23 }
 0x192   : > { %2187 = vmatprep.subr.mxu1 %v3118_v23  ;;  %2149 = vmatpush3.msra.mxu0 %v2508_v29 }
 0x193   : > { %2188 = vmatpush3.msra.mxu1 %v2559_v47  ;;  %2150 = vmatprep.subr.mxu0 %v3118_v23 }
 0x194   : > { %2189 = vmatprep.subr.mxu1 %v3118_v23  ;;  %2151 = vmatpush3.msra.mxu0 %v2543_v42 }
 0x195   : > { %2190 = vmatpush3.msra.mxu1 %v2561_v48  ;;  %2152 = vmatprep.subr.mxu0 %v3118_v23 }
 0x196   : > { %2191 = vmatprep.subr.mxu1 %v3118_v23  ;;  %2153 = vmatpush3.msra.mxu0 %v2549_v44 }
 0x197   : > { %2192 = vmatpush3.msra.mxu1 %v2563_v49  ;;  %2154 = vmatprep.subr.mxu0 %v3118_v23 }
 0x198   : > { %2193 = vmatprep.subr.mxu1 %v3118_v23  ;;  %2155 = vmatpush3.msra.mxu0 %v2569_v51 }
 0x199   : > { %2194 = vmatpush3.msra.mxu1 %v2582_v55  ;;  %2156 = vmatprep.subr.mxu0 %v3118_v23 }
 0x19a   : > { %2195 = vmatprep.subr.mxu1 %v3118_v23  ;;  %2157 = vmatpush3.msra.mxu0 %v2592_v58 }
 0x19b   : > { %2196 = vmatpush3.msra.mxu1 %v2668_v37  ;;  %2158 = vmatprep.subr.mxu0 %v3118_v23 }
 0x19c   : > { %2197 = vmatprep.subr.mxu1 %v3118_v23  ;;  %2159 = vmatpush3.msra.mxu0 %v2606_v62 }
 0x19d   : > { %2198 = vmatpush3.msra.mxu1 %v2676_v43  ;;  %2199 = vmatprep.mubr.msk.f32.mxu1 %vm2344_vm1, %v3118_v23 }
 0x19e   : > { %2160 = vmatprep.subr.mxu0 %v3118_v23  ;;  %2200 = vmatmul.mubr.f32.vlgmr.msra.gmra.mxu1 %v2875_v46 }
 0x19f   : > { %2161 = vmatpush3.msra.mxu0 %v2620_v3  ;;  %2168 = vmatprep.mubr.msk.f32.mxu0 %vm2344_vm1, %v3118_v23 }
 0x1a0   : > { %2162 = vmatprep.subr.mxu0 %v3118_v23 }
 0x1a1   : > { %2163 = vmatpush3.msra.mxu0 %v2631_v10 }
 0x1a2   : > { %2164 = vmatprep.subr.mxu0 %v3118_v23 }
 0x1a3   : > { %2165 = vmatpush3.msra.mxu0 %v2681_v45 }
 0x1a4   : > { %2166 = vmatprep.subr.mxu0 %v3118_v23 }
 0x1a5   : > { %2167 = vmatpush3.msra.mxu0 %v2691_v61 }
 0x1a6   : > { %2169 = vmatmul.mubr.f32.vlgmr.msra.gmra.mxu0 %v2875_v46 }
 0x1ca   : > { %v480_v6 = vpop.f32.mrf.mxu1 }
 0x1cc   : > { %v1891_v7 = vpop.f32.mrf.mxu1 }
 0x1d2   : > { %v339_v8 = vpop.f32.mrf.mxu0 }
 0x1d3   : > { %v481_v19 = vadd.f32 %v480_v6, %v339_v8 }
 0x1d4   : > { %v1860_v9 = vpop.f32.mrf.mxu0 }
 0x1e6   : > { %v667_v11 = vpop.f32.mrf.mxu1 }
 0x1e8   : > { %v1953_v15 = vpop.f32.mrf.mxu1 }
 0x1ef   : > { %v580_v16 = vpop.f32.mrf.mxu0 }
 0x1f0   : > { %v581_v21 = vadd.f32 %v580_v16, %v481_v19 }
 0x1f1   : > { %v1922_v17 = vpop.f32.mrf.mxu0 }
 0x1f2   : > { %v668_v22 = vadd.f32 %v667_v11, %v581_v21 }
 0x204   : > { %v865_v18 = vpop.f32.mrf.mxu1 }
 0x206   : > { %v2015_v20 = vpop.f32.mrf.mxu1 }
 0x20d   : > { %v780_v25 = vpop.f32.mrf.mxu0 }
 0x20e   : > { %v781_v26 = vadd.f32 %v780_v25, %v668_v22 }
 0x20f   : > { %v1984_v27 = vpop.f32.mrf.mxu0 }
 0x210   : > { %v866_v28 = vadd.f32 %v865_v18, %v781_v26 }
 0x212   : > { %870 = vst.msk [vmem:[%s205_s8] sm:$0xff] %vm869_vm3, %v866_v28 }
 0x213   : > { %2263 = shalt.err (!%p2260_p3)
}
 0x214   : > { %s2264_s27 = scalar_lea.hbm %s1518_s12, 128  ;;  %s2268_s30 = scalar_lea.hbm %s3106_s3, 256 }
 0x215   : > { %p2265_p4 = scmp.ne.s32.totalorder %s1518_s12, %s2264_s27  ;;  %p2269_p9 = scmp.lt.s32.totalorder %s1518_s12, %s3106_s3 }
 0x216   : > { %p2270_p10 = scmp.lt.s32.totalorder %s2268_s30, %s2264_s27 }
 0x217   : > { %p2266_p7 = pnand %p2265_p4, %p2411_p5 }
 0x218   : > { %p2271_p11 = por %p2270_p10, %p2269_p9 }
 0x219   : > { %p2267_p8 = pneg %p2266_p7 }
 0x21b   : > { %p2272_p12 = pnand %p2271_p11, %p2267_p8 }
 0x21d   : > { %2275 = shalt.err (!%p2272_p12)
}
 0x21e   : > { %2202 = dma.vmem_to_hbm [thread:$0]  (%p2411_p5), %s1521_s9, 128, %s1518_s12, %s1502_s13  }
 0x21f   : > { %s212_s11 = scalar_lea.vmem [#allocation4], %s1640_s6  ;;  %s1531_s14 = scalar_lea.hbm %s3107_s4, %s1646_s7 }
 0x220   : > { %s1533_s9 = sshll.u32 %s212_s11, 4  ;;  %s1507_s20 = scalar_lea.sflag [#allocation5], %s3040_s5  ;;  %s1534_s9 = int_to_ptr.vmem [resolvable:$true] %s1533_s9 }
 0x221   : > { %s2276_s22 = scalar_lea.vmem %s1534_s9, 128  ;;  %s2347_s23 = smov [#allocation4]  }
 0x222   : > { %v1111_v29 = vpop.f32.mrf.mxu1  ;;  %p2277_p13 = scmp.ne.s32.totalorder %s1534_s9, %s2276_s22  ;;  %s2280_s6 = sshll.u32 %s2347_s23, 4  ;;  %s2281_s6 = int_to_ptr.vmem [resolvable:$false] %s2280_s6 }
 0x223   : > { %s2282_s27 = scalar_lea.vmem %s2281_s6, 256  ;;  %p2283_p2 = scmp.lt.s32.totalorder %s1534_s9, %s2281_s6 }
 0x224   : > { %v2077_v30 = vpop.f32.mrf.mxu1  ;;  %p2278_p0 = pnand %p2277_p13, %p2411_p5  ;;  %p2284_p3 = scmp.lt.s32.totalorder %s2282_s27, %s2276_s22 }
 0x226   : > { %p2279_p1 = pneg %p2278_p0  ;;  %p2285_p4 = por %p2284_p3, %p2283_p2 }
 0x228   : > { %p2286_p7 = pnand %p2285_p4, %p2279_p1 }
 0x22b   : > { %v970_v31 = vpop.f32.mrf.mxu0 }
 0x22c   : > { %v1112_v51 = vadd.f32 %v1111_v29, %v970_v31 }
 0x22d   : > { %v2046_v36 = vpop.f32.mrf.mxu0 }
 0x240   : > { %v1298_v42 = vpop.f32.mrf.mxu1 }
 0x242   : > { %v2139_v44 = vpop.f32.mrf.mxu1 }
 0x249   : > { %v1211_v47 = vpop.f32.mrf.mxu0 }
 0x24a   : > { %v1212_v54 = vadd.f32 %v1211_v47, %v1112_v51 }
 0x24b   : > { %v2108_v48 = vpop.f32.mrf.mxu0 }
 0x24c   : > { %v1299_v55 = vadd.f32 %v1298_v42, %v1212_v54 }
 0x25e   : > { %v1496_v49 = vpop.f32.mrf.mxu1 }
 0x260   : > { %v2201_v53 = vpop.f32.mrf.mxu1 }
 0x266   : > { %v1411_v58 = vpop.f32.mrf.mxu0 }
 0x267   : > { %v1412_v59 = vadd.f32 %v1411_v58, %v1299_v55 }
 0x268   : > { %v2170_v62 = vpop.f32.mrf.mxu0 }
 0x269   : > { %v1497_v63 = vadd.f32 %v1496_v49, %v1412_v59 }
 0x26b   : > { %1500 = vst.msk [vmem:[%s212_s11] sm:$0xff] %vm869_vm3, %v1497_v63 }
 0x26c   : > { %2289 = shalt.err (!%p2286_p7)
}
 0x26d   : > { %s2290_s19 = scalar_lea.hbm %s1531_s14, 128  ;;  %s2294_s28 = scalar_lea.hbm %s3107_s4, 256 }
 0x26e   : > { %p2291_p8 = scmp.ne.s32.totalorder %s1531_s14, %s2290_s19  ;;  %p2295_p11 = scmp.lt.s32.totalorder %s1531_s14, %s3107_s4 }
 0x26f   : > { %p2296_p12 = scmp.lt.s32.totalorder %s2294_s28, %s2290_s19 }
 0x270   : > { %p2292_p9 = pnand %p2291_p8, %p2411_p5 }
 0x271   : > { %p2297_p13 = por %p2296_p12, %p2295_p11 }
 0x272   : > { %p2293_p10 = pneg %p2292_p9 }
 0x274   : > { %p2298_p0 = pnand %p2297_p13, %p2293_p10 }
 0x276   : > { %2301 = shalt.err (!%p2298_p0)
}
 0x277   : > { %2203 = dma.vmem_to_hbm [thread:$0]  (%p2411_p5), %s1534_s9, 128, %s1531_s14, %s1507_s20  }
 0x278 PF: > { %p2213_p1 = scmp.ge.s32.totalorder %s2340_s18, 2  ;;  %s1545_s8 = sand.u32 1, %s2328_s15  }
 0x279   : > { %s1546_s10 = scalar_lea.sflag [#allocation3], %s1545_s8 }
 0x27a   : > { %p2207_p2 = pnand %p2213_p1, %p2415_p6 }
 0x27c   : > { %p2208_p3 = pneg %p2207_p2 }
 0x27e   : > { %2319 = dma.done.wait (%p2208_p3), %s1546_s10, 128  }
 0x27f   : > { %2321 = vsyncadd (%p2208_p3), %s1546_s10, 4294967168  ;;  %s1555_s11 = scalar_lea.sflag [#allocation5], %s1545_s8 }
 0x280   : > { %2323 = dma.done.wait (%p2208_p3), %s1555_s11, 128  }
 0x281   : > { %2325 = vsyncadd (%p2208_p3), %s1555_s11, 4294967168  ;;  %p18_p5 = scmp.ge.s32.totalorder %s2398_s21, 4   ;;  %s3122_s15 = smov %s2332_s16 }
 0x282   : > { %s3123_s16 = smov %s2336_s17  ;;  %s3124_s17 = smov %s2409_s24 }
 0x283   : > { %s3125_s18 = smov %s2398_s21  ;;  %20 = sbr.rel (!%p18_p5) target bundleno = 5 (0x5), region = 87 }
 0x288   :  { %1560 = vsyncpa [#allocation3], 1 }
 0x289   :  { %1562 = vsyncpa [#allocation3 + $0x1], 1 }
 0x28a   :  { %1563 = vsyncpa [#allocation5], 1 }
 0x28b   :  { %1565 = vsyncpa [#allocation5 + $0x1], 1 }

</bundles_post_ra>
